<compile_context>
chip_gen: v5e
topology: v5e:2x2
jax: 0.10.0
libtpu: 0.0.40
codegen_flags: <defaults>
</compile_context>

<pallas_src>
import functools

import jax
import jax.numpy as jnp
from jax.experimental import pallas as pl
from jax.experimental.pallas import tpu as pltpu


def _swish(x):
    return x * (1.0 / (1.0 + jnp.exp(-x)))


def actor_critic_kernel(
    state_ref,      # [TB, S]
    w1_ref,         # [S, H1]
    b1_ref,         # [1, H1]
    w2_ref,         # [H1, H2]
    b2_ref,         # [1, H2]
    wh_ref,         # [H2, A+1]  fused (actor_fc | critic_fc)
    bh_ref,         # [1, A+1]
    scale_ref,      # [1, A]     softplus(std), precomputed in wrapper
    logscale_ref,   # [1, A]     log(softplus(std)), precomputed in wrapper
    noise_ref,      # [TB, A]    eps ~ N(0, 1)
    out_ref,        # [TB, A+2]  actions | log_prob | value
    *,
    action_size: int,
):
    A = action_size

    x = state_ref[...]

    # fc1 + swish, fc2 + swish
    h = _swish(jnp.dot(x, w1_ref[...], preferred_element_type=jnp.float32) + b1_ref[...])
    h = _swish(jnp.dot(h, w2_ref[...], preferred_element_type=jnp.float32) + b2_ref[...])

    # Fused actor/critic head: one MXU pass, split on the lane axis afterwards.
    head = jnp.dot(h, wh_ref[...], preferred_element_type=jnp.float32) + bh_ref[...]
    mu = jnp.tanh(head[:, :A])           # actor columns -> tanh
    values = head[:, A:A + 1]            # critic column  -> raw

    eps = noise_ref[...]
    scale = scale_ref[...]

    # dist.sample(): actions = mu + softplus(std) * eps
    actions = mu + scale * eps

    # dist.log_prob(actions) with z == eps exactly (no subtract / divide needed).
    half_log2pi = jnp.float32(0.5) * jnp.log(jnp.float32(2.0) * jnp.pi)
    logp = jnp.sum(
        -0.5 * eps * eps - logscale_ref[...] - half_log2pi,
        axis=-1,
        keepdims=True,
    )

    # Single packed output slab: actions | log_prob | value
    out_ref[:, 0:A] = actions
    out_ref[:, A:A + 1] = logp
    out_ref[:, A + 1:A + 2] = values


def _round_up(x, m):
    return ((x + m - 1) // m) * m


def actor_critic_forward(state, params, noise, *, block_b=256):
    """ActorCritic forward in a single Pallas kernel.

    state: [B, S] f32; noise: [B, A] f32 standard-normal draws (dist.sample eps).
    params: dict with w1,b1,w2,b2,wa,ba,wc,bc,std (weights stored as [in, out]).
    Returns (actions [B,A], log_prob [B], entropy [B], values [B]).
    """
    B, S = state.shape
    A = params["wa"].shape[1]

    # --- wrapper-side preprocessing: head fusion + std-only math ---
    w_head = jnp.concatenate([params["wa"], params["wc"]], axis=1)   # [H2, A+1]
    b_head = jnp.concatenate([params["ba"], params["bc"]], axis=1)   # [1, A+1]

    std = params["std"]                         # [1, A]
    scale = jax.nn.softplus(std)                # numerically stable softplus
    log_scale = jnp.log(scale)
    log2pi = jnp.log(2.0 * jnp.pi)
    entropy_scalar = jnp.sum(0.5 + 0.5 * log2pi + log_scale)   # batch-independent

    # --- batch tiling (TB multiple of 8, weights resident across the grid) ---
    TB = min(block_b, _round_up(B, 8))
    Bp = _round_up(B, TB)
    if Bp != B:
        state = jnp.pad(state, ((0, Bp - B), (0, 0)))
        noise = jnp.pad(noise, ((0, Bp - B), (0, 0)))

    OUT = A + 2
    grid = (Bp // TB,)

    def tiled(shape):
        return pl.BlockSpec(shape, lambda i: (i, 0))

    def resident(arr):
        return pl.BlockSpec(arr.shape, lambda i: (0, 0))

    inputs = (
        state,
        params["w1"], params["b1"],
        params["w2"], params["b2"],
        w_head, b_head,
        scale, log_scale,
        noise,
    )
    in_specs = [
        tiled((TB, S)),
        resident(params["w1"]), resident(params["b1"]),
        resident(params["w2"]), resident(params["b2"]),
        resident(w_head), resident(b_head),
        resident(scale), resident(log_scale),
        tiled((TB, A)),
    ]

    out = pl.pallas_call(
        functools.partial(actor_critic_kernel, action_size=A),
        out_shape=jax.ShapeDtypeStruct((Bp, OUT), jnp.float32),
        grid_spec=pl.GridSpec(
            grid=grid,
            in_specs=in_specs,
            out_specs=tiled((TB, OUT)),
        ),
        compiler_params=pltpu.CompilerParams(
            dimension_semantics=("parallel",),
        ),
    )(*inputs)

    out = out[:B]
    actions = out[:, :A]
    log_prob = out[:, A]
    values = out[:, A + 1]
    entropy = jnp.full((B,), entropy_scalar, dtype=jnp.float32)
    return actions, log_prob, entropy, values


def init_params(key, state_size, action_size, fc1_units=64, fc2_units=64):
    """PyTorch-Linear-style init (uniform +-1/sqrt(fan_in)); weights stored [in, out]."""
    ks = jax.random.split(key, 8)

    def lin(kw, kb, fan_in, fan_out):
        bound = 1.0 / jnp.sqrt(jnp.float32(fan_in))
        w = jax.random.uniform(kw, (fan_in, fan_out), jnp.float32, -bound, bound)
        b = jax.random.uniform(kb, (1, fan_out), jnp.float32, -bound, bound)
        return w, b

    w1, b1 = lin(ks[0], ks[1], state_size, fc1_units)
    w2, b2 = lin(ks[2], ks[3], fc1_units, fc2_units)
    wa, ba = lin(ks[4], ks[5], fc2_units, action_size)
    wc, bc = lin(ks[6], ks[7], fc2_units, 1)
    std = jnp.zeros((1, action_size), jnp.float32)  # nn.Parameter(torch.zeros(A))

    return dict(w1=w1, b1=b1, w2=w2, b2=b2, wa=wa, ba=ba, wc=wc, bc=bc, std=std)


def reference_forward(state, params, noise):
    """Pure-JAX reference matching the PyTorch module semantics."""
    def swish(x):
        return x * jax.nn.sigmoid(x)

    h = swish(state @ params["w1"] + params["b1"])
    h = swish(h @ params["w2"] + params["b2"])
    mu = jnp.tanh(h @ params["wa"] + params["ba"])
    values = (h @ params["wc"] + params["bc"])[:, 0]
    scale = jax.nn.softplus(params["std"])
    log_scale = jnp.log(scale)
    log2pi = jnp.log(2.0 * jnp.pi)
    actions = mu + scale * noise
    log_prob = jnp.sum(-0.5 * noise * noise - log_scale - 0.5 * log2pi, axis=-1)
    entropy = jnp.full((state.shape[0],), jnp.sum(0.5 + 0.5 * log2pi + log_scale))
    return actions, log_prob, entropy, values


if __name__ == "__main__":
    B, S, A = 8, 16, 4  # batch, state_size, action_size
    key = jax.random.PRNGKey(0)
    k_state, k_noise, k_params = jax.random.split(key, 3)

    state = jax.random.normal(k_state, (B, S), jnp.float32)
    noise = jax.random.normal(k_noise, (B, A), jnp.float32)  # dist.sample() eps
    params = init_params(k_params, S, A)

    actions, log_prob, entropy, values = actor_critic_forward(state, params, noise)
    jax.block_until_ready((actions, log_prob, entropy, values))

    assert actions.shape == (B, A)
    assert log_prob.shape == (B,)
    assert entropy.shape == (B,)
    assert values.shape == (B,)

    ra, rl, re, rv = reference_forward(state, params, noise)
    assert jnp.allclose(actions, ra, atol=1e-3, rtol=1e-3)
    assert jnp.allclose(log_prob, rl, atol=1e-3, rtol=1e-3)
    assert jnp.allclose(entropy, re, atol=1e-3, rtol=1e-3)
    assert jnp.allclose(values, rv, atol=1e-3, rtol=1e-3)

    print("KERNEL_OK")
</pallas_src>

<mosaic_0001>
module attributes {stable_mosaic.version = 11 : i64} {
  func.func @actor_critic_kernel(%arg0: i32, %arg1: memref<8x16xf32, #tpu.memory_space<vmem>>, %arg2: memref<16x64xf32, #tpu.memory_space<vmem>>, %arg3: memref<1x64xf32, #tpu.memory_space<vmem>>, %arg4: memref<64x64xf32, #tpu.memory_space<vmem>>, %arg5: memref<1x64xf32, #tpu.memory_space<vmem>>, %arg6: memref<64x5xf32, #tpu.memory_space<vmem>>, %arg7: memref<1x5xf32, #tpu.memory_space<vmem>>, %arg8: memref<1x4xf32, #tpu.memory_space<vmem>>, %arg9: memref<1x4xf32, #tpu.memory_space<vmem>>, %arg10: memref<8x4xf32, #tpu.memory_space<vmem>>, %arg11: memref<8x6xf32, #tpu.memory_space<vmem>>) attributes {dimension_semantics = [#tpu.dimension_semantics<parallel>], iteration_bounds = array<i64: 1>, scalar_prefetch = 0 : i64, scratch_operands = 0 : i64, tpu.core_type = #tpu.core_type<tc>, window_params = [{transform_indices = @transform_0, window_bounds = array<i64: 8, 16>}, {pipeline_mode = #tpu.pipeline_mode<synchronous>, transform_indices = @transform_1, window_bounds = array<i64: 16, 64>}, {pipeline_mode = #tpu.pipeline_mode<synchronous>, transform_indices = @transform_2, window_bounds = array<i64: 1, 64>}, {pipeline_mode = #tpu.pipeline_mode<synchronous>, transform_indices = @transform_3, window_bounds = array<i64: 64, 64>}, {pipeline_mode = #tpu.pipeline_mode<synchronous>, transform_indices = @transform_4, window_bounds = array<i64: 1, 64>}, {pipeline_mode = #tpu.pipeline_mode<synchronous>, transform_indices = @transform_5, window_bounds = array<i64: 64, 5>}, {pipeline_mode = #tpu.pipeline_mode<synchronous>, transform_indices = @transform_6, window_bounds = array<i64: 1, 5>}, {pipeline_mode = #tpu.pipeline_mode<synchronous>, transform_indices = @transform_7, window_bounds = array<i64: 1, 4>}, {pipeline_mode = #tpu.pipeline_mode<synchronous>, transform_indices = @transform_8, window_bounds = array<i64: 1, 4>}, {transform_indices = @transform_9, window_bounds = array<i64: 8, 4>}, {transform_indices = @transform_10, window_bounds = array<i64: 8, 6>}]} {
    %c0 = arith.constant 0 : index
    %c0_0 = arith.constant 0 : index
    %0 = vector.load %arg1[%c0, %c0_0] : memref<8x16xf32, #tpu.memory_space<vmem>>, vector<8x16xf32>
    %c0_1 = arith.constant 0 : index
    %c0_2 = arith.constant 0 : index
    %1 = vector.load %arg2[%c0_1, %c0_2] : memref<16x64xf32, #tpu.memory_space<vmem>>, vector<16x64xf32>
    %cst = arith.constant dense<0.000000e+00> : vector<8x64xf32>
    %2 = tpu.matmul %0, %1, %cst {dimension_numbers = #tpu.dot_dimension_numbers<[1], [0], [0], [1], [0, 0, 1, 1], [], []>} : vector<8x16xf32>, vector<16x64xf32>, vector<8x64xf32> -> vector<8x64xf32>
    %c0_3 = arith.constant 0 : index
    %c0_4 = arith.constant 0 : index
    %3 = vector.load %arg3[%c0_3, %c0_4] : memref<1x64xf32, #tpu.memory_space<vmem>>, vector<1x64xf32>
    %4 = vector.broadcast %3 : vector<1x64xf32> to vector<8x64xf32>
    %5 = arith.addf %2, %4 : vector<8x64xf32>
    %cst_5 = arith.constant 0.000000e+00 : f32
    %6 = vector.broadcast %cst_5 : f32 to vector<8x64xf32>
    %7 = arith.subf %6, %5 : vector<8x64xf32>
    %8 = math.exp %7 : vector<8x64xf32>
    %cst_6 = arith.constant 1.000000e+00 : f32
    %9 = vector.broadcast %cst_6 : f32 to vector<8x64xf32>
    %10 = arith.addf %9, %8 : vector<8x64xf32>
    %cst_7 = arith.constant 1.000000e+00 : f32
    %11 = vector.broadcast %cst_7 : f32 to vector<8x64xf32>
    %12 = arith.divf %11, %10 : vector<8x64xf32>
    %13 = arith.mulf %5, %12 : vector<8x64xf32>
    %c0_8 = arith.constant 0 : index
    %c0_9 = arith.constant 0 : index
    %14 = vector.load %arg4[%c0_8, %c0_9] : memref<64x64xf32, #tpu.memory_space<vmem>>, vector<64x64xf32>
    %cst_10 = arith.constant dense<0.000000e+00> : vector<8x64xf32>
    %15 = tpu.matmul %13, %14, %cst_10 {dimension_numbers = #tpu.dot_dimension_numbers<[1], [0], [0], [1], [0, 0, 1, 1], [], []>} : vector<8x64xf32>, vector<64x64xf32>, vector<8x64xf32> -> vector<8x64xf32>
    %c0_11 = arith.constant 0 : index
    %c0_12 = arith.constant 0 : index
    %16 = vector.load %arg5[%c0_11, %c0_12] : memref<1x64xf32, #tpu.memory_space<vmem>>, vector<1x64xf32>
    %17 = vector.broadcast %16 : vector<1x64xf32> to vector<8x64xf32>
    %18 = arith.addf %15, %17 : vector<8x64xf32>
    %cst_13 = arith.constant 0.000000e+00 : f32
    %19 = vector.broadcast %cst_13 : f32 to vector<8x64xf32>
    %20 = arith.subf %19, %18 : vector<8x64xf32>
    %21 = math.exp %20 : vector<8x64xf32>
    %cst_14 = arith.constant 1.000000e+00 : f32
    %22 = vector.broadcast %cst_14 : f32 to vector<8x64xf32>
    %23 = arith.addf %22, %21 : vector<8x64xf32>
    %cst_15 = arith.constant 1.000000e+00 : f32
    %24 = vector.broadcast %cst_15 : f32 to vector<8x64xf32>
    %25 = arith.divf %24, %23 : vector<8x64xf32>
    %26 = arith.mulf %18, %25 : vector<8x64xf32>
    %c0_16 = arith.constant 0 : index
    %c0_17 = arith.constant 0 : index
    %27 = vector.load %arg6[%c0_16, %c0_17] : memref<64x5xf32, #tpu.memory_space<vmem>>, vector<64x5xf32>
    %cst_18 = arith.constant dense<0.000000e+00> : vector<8x5xf32>
    %28 = tpu.matmul %26, %27, %cst_18 {dimension_numbers = #tpu.dot_dimension_numbers<[1], [0], [0], [1], [0, 0, 1, 1], [], []>} : vector<8x64xf32>, vector<64x5xf32>, vector<8x5xf32> -> vector<8x5xf32>
    %c0_19 = arith.constant 0 : index
    %c0_20 = arith.constant 0 : index
    %29 = vector.load %arg7[%c0_19, %c0_20] : memref<1x5xf32, #tpu.memory_space<vmem>>, vector<1x5xf32>
    %30 = vector.broadcast %29 : vector<1x5xf32> to vector<8x5xf32>
    %31 = arith.addf %28, %30 : vector<8x5xf32>
    %32 = vector.extract_strided_slice %31 {offsets = [0, 0], sizes = [8, 4], strides = [1, 1]} : vector<8x5xf32> to vector<8x4xf32>
    %33 = math.tanh %32 : vector<8x4xf32>
    %34 = vector.extract_strided_slice %31 {offsets = [0, 4], sizes = [8, 1], strides = [1, 1]} : vector<8x5xf32> to vector<8x1xf32>
    %c0_21 = arith.constant 0 : index
    %c0_22 = arith.constant 0 : index
    %35 = vector.load %arg10[%c0_21, %c0_22] : memref<8x4xf32, #tpu.memory_space<vmem>>, vector<8x4xf32>
    %c0_23 = arith.constant 0 : index
    %c0_24 = arith.constant 0 : index
    %36 = vector.load %arg8[%c0_23, %c0_24] : memref<1x4xf32, #tpu.memory_space<vmem>>, vector<1x4xf32>
    %37 = vector.broadcast %36 : vector<1x4xf32> to vector<8x4xf32>
    %38 = arith.mulf %37, %35 : vector<8x4xf32>
    %39 = arith.addf %33, %38 : vector<8x4xf32>
    %cst_25 = arith.constant 2.000000e+00 : f32
    %cst_26 = arith.constant 3.14159274 : f32
    %40 = arith.mulf %cst_25, %cst_26 : f32
    %41 = math.log %40 : f32
    %cst_27 = arith.constant 5.000000e-01 : f32
    %42 = arith.mulf %cst_27, %41 : f32
    %cst_28 = arith.constant -5.000000e-01 : f32
    %43 = vector.broadcast %cst_28 : f32 to vector<8x4xf32>
    %44 = arith.mulf %43, %35 : vector<8x4xf32>
    %45 = arith.mulf %44, %35 : vector<8x4xf32>
    %c0_29 = arith.constant 0 : index
    %c0_30 = arith.constant 0 : index
    %46 = vector.load %arg9[%c0_29, %c0_30] : memref<1x4xf32, #tpu.memory_space<vmem>>, vector<1x4xf32>
    %47 = vector.broadcast %46 : vector<1x4xf32> to vector<8x4xf32>
    %48 = arith.subf %45, %47 : vector<8x4xf32>
    %49 = vector.broadcast %42 : f32 to vector<8x4xf32>
    %50 = arith.subf %48, %49 : vector<8x4xf32>
    %cst_31 = arith.constant dense<0.000000e+00> : vector<8xf32>
    %51 = vector.multi_reduction <add>, %50, %cst_31 [1] : vector<8x4xf32> to vector<8xf32>
    %52 = vector.shape_cast %51 : vector<8xf32> to vector<8x1xf32>
    %c0_32 = arith.constant 0 : index
    %c0_33 = arith.constant 0 : index
    %53 = vector.load %arg11[%c0_32, %c0_33] : memref<8x6xf32, #tpu.memory_space<vmem>>, vector<8x4xf32>
    tpu.vector_store %arg11[%c0_32, %c0_33], %39 {strides = array<i32>} : memref<8x6xf32, #tpu.memory_space<vmem>>, vector<8x4xf32>,
    %c0_34 = arith.constant 0 : index
    %c4 = arith.constant 4 : index
    %54 = vector.load %arg11[%c0_34, %c4] : memref<8x6xf32, #tpu.memory_space<vmem>>, vector<8x1xf32>
    tpu.vector_store %arg11[%c0_34, %c4], %52 {strides = array<i32>} : memref<8x6xf32, #tpu.memory_space<vmem>>, vector<8x1xf32>,
    %c0_35 = arith.constant 0 : index
    %c5 = arith.constant 5 : index
    %55 = vector.load %arg11[%c0_35, %c5] : memref<8x6xf32, #tpu.memory_space<vmem>>, vector<8x1xf32>
    tpu.vector_store %arg11[%c0_35, %c5], %34 {strides = array<i32>} : memref<8x6xf32, #tpu.memory_space<vmem>>, vector<8x1xf32>,
    return
  }
  func.func @transform_0(%arg0: i32) -> (i32, i32) {
    %c0_i32 = arith.constant 0 : i32
    %c0_i32_0 = arith.constant 0 : i32
    return %arg0, %c0_i32 : i32, i32
  }
  func.func @transform_1(%arg0: i32) -> (i32, i32) {
    %c0_i32 = arith.constant 0 : i32
    %c0_i32_0 = arith.constant 0 : i32
    %c0_i32_1 = arith.constant 0 : i32
    return %c0_i32, %c0_i32_0 : i32, i32
  }
  func.func @transform_2(%arg0: i32) -> (i32, i32) {
    %c0_i32 = arith.constant 0 : i32
    %c0_i32_0 = arith.constant 0 : i32
    %c0_i32_1 = arith.constant 0 : i32
    return %c0_i32, %c0_i32_0 : i32, i32
  }
  func.func @transform_3(%arg0: i32) -> (i32, i32) {
    %c0_i32 = arith.constant 0 : i32
    %c0_i32_0 = arith.constant 0 : i32
    %c0_i32_1 = arith.constant 0 : i32
    return %c0_i32, %c0_i32_0 : i32, i32
  }
  func.func @transform_4(%arg0: i32) -> (i32, i32) {
    %c0_i32 = arith.constant 0 : i32
    %c0_i32_0 = arith.constant 0 : i32
    %c0_i32_1 = arith.constant 0 : i32
    return %c0_i32, %c0_i32_0 : i32, i32
  }
  func.func @transform_5(%arg0: i32) -> (i32, i32) {
    %c0_i32 = arith.constant 0 : i32
    %c0_i32_0 = arith.constant 0 : i32
    %c0_i32_1 = arith.constant 0 : i32
    return %c0_i32, %c0_i32_0 : i32, i32
  }
  func.func @transform_6(%arg0: i32) -> (i32, i32) {
    %c0_i32 = arith.constant 0 : i32
    %c0_i32_0 = arith.constant 0 : i32
    %c0_i32_1 = arith.constant 0 : i32
    return %c0_i32, %c0_i32_0 : i32, i32
  }
  func.func @transform_7(%arg0: i32) -> (i32, i32) {
    %c0_i32 = arith.constant 0 : i32
    %c0_i32_0 = arith.constant 0 : i32
    %c0_i32_1 = arith.constant 0 : i32
    return %c0_i32, %c0_i32_0 : i32, i32
  }
  func.func @transform_8(%arg0: i32) -> (i32, i32) {
    %c0_i32 = arith.constant 0 : i32
    %c0_i32_0 = arith.constant 0 : i32
    %c0_i32_1 = arith.constant 0 : i32
    return %c0_i32, %c0_i32_0 : i32, i32
  }
  func.func @transform_9(%arg0: i32) -> (i32, i32) {
    %c0_i32 = arith.constant 0 : i32
    %c0_i32_0 = arith.constant 0 : i32
    return %arg0, %c0_i32 : i32, i32
  }
  func.func @transform_10(%arg0: i32) -> (i32, i32) {
    %c0_i32 = arith.constant 0 : i32
    %c0_i32_0 = arith.constant 0 : i32
    return %arg0, %c0_i32 : i32, i32
  }
}

</mosaic_0001>

<bundles_post_ra>
// kernel: tpu_custom_call.1
= control target key start
LH: loop header
LB: loop body
LE: loop exit
PB: predicated region body
PF: predicated region fallthrough
CT: control target
= control target key end

     0   :  { %15 = vsyncpa [#allocation3], 0  ;;  %s455_s0 = inlined_call_operand.vmem [shape: f32[8,16], index: 0, kind: input, shape index: {}]   ;;  %s456_s1 = inlined_call_operand.hbm [shape: f32[16,64], index: 1, kind: input, shape index: {}]   ;;  %s457_s2 = inlined_call_operand.vmem [shape: f32[1,64], index: 2, kind: input, shape index: {}]   ;;  %s458_s3 = inlined_call_operand.vmem [shape: f32[64,64], index: 3, kind: input, shape index: {}]   ;;  %s459_s4 = inlined_call_operand.vmem [shape: f32[1,64], index: 4, kind: input, shape index: {}]   ;;  %s460_s5 = inlined_call_operand.vmem [shape: f32[64,5], index: 5, kind: input, shape index: {}]   ;;  %s461_s6 = inlined_call_operand.vmem [shape: f32[1,5], index: 6, kind: input, shape index: {}]   ;;  %s462_s7 = inlined_call_operand.vmem [shape: f32[1,4], index: 7, kind: input, shape index: {}]   ;;  %s463_s8 = inlined_call_operand.vmem [shape: f32[1,4], index: 8, kind: input, shape index: {}]   ;;  %s464_s9 = inlined_call_operand.vmem [shape: f32[8,4], index: 9, kind: input, shape index: {}]   ;;  %s465_s10 = inlined_call_operand.hbm [shape: f32[8,6], index: 10, kind: output, shape index: {}]  }
   0x1   :  { %16 = vsyncpa [#allocation4], 0  ;;  %s23_s15 = sshll.u32 %s456_s1, 4  ;;  %s316_s16 = smov [#allocation2]   ;;  %s24_s15 = int_to_ptr.hbm [resolvable:$true] %s23_s15 }
   0x2   :  { %s25_s17 = sshll.u32 %s316_s16, 4  ;;  %s317_s18 = smov 128   ;;  %s26_s17 = int_to_ptr.vmem [resolvable:$true] %s25_s17 }
   0x3   :  { %s318_s19 = smov 8  }
   0x4   :  { %31 = dma.hbm_to_vmem [thread:$0]  %s24_s15, 256, %s26_s17, [#allocation3], %s317_s18, %s317_s18, %s318_s19  }
   0x5   :  { %312 = dma.done.wait [#allocation3], 256  }
   0x6   :  { %313 = vsyncadd [#allocation3], 4294967040  ;;  %v54_v0 = vld [vmem:[#allocation2 + $0x8] sm:$0xff]  ;;  %v53_v1 = vld [vmem:[#allocation2] sm:$0xff]  ;;  %vm59_vm0 = vcmask 130048   ;;  %vm115_vm5 = vcmask 523264  }
   0x7   :  { %77 = vmatpush.msra.mxu0 %v54_v0  ;;  %v52_v2 = vld [vmem:[%s455_s0] sm:$0xff]  ;;  %v110_v3 = vld [vmem:[%s458_s3 + $0x38] sm:$0xff]  ;;  %v109_v4 = vld [vmem:[%s458_s3 + $0x30] sm:$0xff]  ;;  %vm210_vm6 = vcmask 31744   ;;  %s319_s16 = smov 1   ;;  %vm215_vm11 = vcmask 39968  }
   0x8   :  { %127 = vmatpush.msra.mxu1 %v110_v3  ;;  %v108_v5 = vld [vmem:[%s458_s3 + $0x28] sm:$0xff]  ;;  %v107_v6 = vld [vmem:[%s458_s3 + $0x20] sm:$0xff]  ;;  %v106_v7 = vld [vmem:[%s458_s3 + $0x18] sm:$0xff]  ;;  %s320_s17 = smov [#allocation5]   ;;  %s230_s18 = sshll.u32 %s465_s10, 4  ;;  %vm221_vm12 = vcmask 48168   ;;  %s231_s18 = int_to_ptr.hbm [resolvable:$true] %s230_s18 }
   0x9   :  { %78 = vmatpush.msra.mxu0 %v53_v1  ;;  %v249_v8 = vld [vmem:[%s457_s2] ss:$0 sm:$0xff]  ;;  %v105_v9 = vld [vmem:[%s458_s3 + $0x10] sm:$0xff]  ;;  %v104_v10 = vld [vmem:[%s458_s3 + $0x8] sm:$0xff]  ;;  %s228_s2 = sshll.u32 %s320_s17, 4  ;;  %s229_s2 = int_to_ptr.vmem [resolvable:$true] %s228_s2 }
   0xa   :  { %240 = vmatmul.msk.f32.vlgmr.msra.gmra.mxu0 %vm59_vm0, %v52_v2  ;;  %128 = vmatpush.msra.mxu1 %v109_v4  ;;  %v103_v13 = vld [vmem:[%s458_s3] sm:$0xff]  ;;  %v166_v29 = vld [vmem:[%s460_s5 + $0x38] sm:$0xff]  ;;  %v165_v30 = vld [vmem:[%s460_s5 + $0x30] sm:$0xff] }
   0xb   :  { %182 = vmatpush.msra.mxu2 %v166_v29  ;;  %v164_v31 = vld [vmem:[%s460_s5 + $0x28] sm:$0xff]  ;;  %v163_v32 = vld [vmem:[%s460_s5 + $0x20] sm:$0xff]  ;;  %v162_v33 = vld [vmem:[%s460_s5 + $0x18] sm:$0xff] }
   0xc   :  { %129 = vmatpush.msra.mxu1 %v108_v5  ;;  %v250_v34 = vld [vmem:[%s459_s4] ss:$0 sm:$0xff]  ;;  %v161_v35 = vld [vmem:[%s460_s5 + $0x10] sm:$0xff]  ;;  %v160_v36 = vld [vmem:[%s460_s5 + $0x8] sm:$0xff] }
   0xd   :  { %183 = vmatpush.msra.mxu2 %v165_v30  ;;  %v159_v39 = vld [vmem:[%s460_s5] sm:$0xff] }
   0xe   :  { %130 = vmatpush.msra.mxu1 %v107_v6  ;;  %v195_v41 = vld [vmem:[%s464_s9] sm:$0xff] }
   0xf   :  { %184 = vmatpush.msra.mxu2 %v164_v31  ;;  %v202_v42 = vmul.f32 -0.5, %v195_v41  ;;  %v252_v43 = vld [vmem:[%s463_s8] ss:$0 sm:$0xff] }
  0x10   :  { %131 = vmatpush.msra.mxu1 %v106_v7  ;;  %v253_v62 = vld [vmem:[%s461_s6] ss:$0 sm:$0xff] }
  0x11   :  { %185 = vmatpush.msra.mxu2 %v163_v32  ;;  %v203_v45 = vmul.f32 %v202_v42, %v195_v41  ;;  %v251_v1 = vld [vmem:[%s462_s7] ss:$0 sm:$0xff] }
  0x12   :  { %132 = vmatpush.msra.mxu1 %v105_v9  ;;  %v200_v2 = vmul.f32 %v251_v1, %v195_v41 }
  0x13   :  { %186 = vmatpush.msra.mxu2 %v162_v33  ;;  %v208_v46 = vsub.f32 %v203_v45, %v252_v43 }
  0x14   :  { %133 = vmatpush.msra.mxu1 %v104_v10 }
  0x15   :  { %187 = vmatpush.msra.mxu2 %v161_v35  ;;  %v243_v47 = vadd.f32 -0.9189385, %v208_v46 }
  0x16   :  { %134 = vmatpush.msra.mxu1 %v103_v13 }
  0x17   :  { %188 = vmatpush.msra.mxu2 %v160_v36  ;;  %v211_v48 = vsel %vm210_vm6, %v243_v47, 0.0 }
  0x18   :  { %212 = vadd.xlane.f32.xlu0 %v211_v48 }
  0x19   :  { %189 = vmatpush.msra.mxu2 %v159_v39 }
  0x87   :  { %v80_v11 = vpop.f32.mrf.mxu0 }
  0x88   :  { %v81_v12 = vadd.f32 %v249_v8, %v80_v11 }
  0x8a   :  { %v83_v14 = vsub.f32 0.0, %v81_v12 }
  0x8b   :  { %v213_v5 = vpop.xlane.xlu0 %212 }
  0x8c   :  { %v84_v15 = vmul.f32 1.442695, %v83_v14 }
  0x8e   :  { %254 = vpow2.f32 %v84_v15 }
  0x94   :  { %v255_v16 = vpop.eup %254 }
  0x95   :  { %v86_v17 = vadd.f32 1.0, %v255_v16 }
  0x97   :  { %256 = vrcp.f32 %v86_v17  ;;  %v98_v21 = vand.u32 2147483648, %v86_v17  ;;  %v96_v23 = vand.u32 2147483647, %v86_v17  ;;  %vm92_vm2 = vweird.f32 %v86_v17 }
  0x99   :  { %v99_v25 = vor.u32 1.1754944e-38, %v98_v21  ;;  %vm97_vm4 = vcmp.eq.f32.partialorder %v96_v23, 8.507059e+37 }
  0x9d   :  { %v257_v18 = vpop.eup %256 }
  0x9e   :  { %v88_v19 = vmul.f32 %v257_v18, %v86_v17  ;;  %vm93_vm1 = vweird.f32 %v257_v18 }
  0x9f   :  { %vm94_vm3 = vmor %vm92_vm2, %vm93_vm1 }
  0xa0   :  { %v89_v20 = vsub.f32 1.0, %v88_v19 }
  0xa2   :  { %v90_v22 = vmul.f32 %v257_v18, %v89_v20 }
  0xa4   :  { %v91_v24 = vadd.f32 %v257_v18, %v90_v22 }
  0xa6   :  { %v95_v26 = vsel %vm94_vm3, %v257_v18, %v91_v24 }
  0xa7   :  { %v100_v27 = vsel %vm97_vm4, %v99_v25, %v95_v26 }
  0xa8   :  { %v102_v28 = vmul.f32 %v100_v27, %v81_v12 }
  0xaa   :  { %241 = vmatmul.msk.f32.vlgmr.msra.gmra.mxu1 %vm115_vm5, %v102_v28 }
 0x127   :  { %v136_v37 = vpop.f32.mrf.mxu1 }
 0x128   :  { %v137_v38 = vadd.f32 %v250_v34, %v136_v37 }
 0x12a   :  { %v139_v40 = vsub.f32 0.0, %v137_v38 }
 0x12c   :  { %v140_v44 = vmul.f32 1.442695, %v139_v40 }
 0x12e   :  { %258 = vpow2.f32 %v140_v44 }
 0x134   :  { %v259_v49 = vpop.eup %258 }
 0x135   :  { %v142_v50 = vadd.f32 1.0, %v259_v49 }
 0x137   :  { %260 = vrcp.f32 %v142_v50  ;;  %v154_v54 = vand.u32 2147483648, %v142_v50  ;;  %v152_v56 = vand.u32 2147483647, %v142_v50  ;;  %vm148_vm8 = vweird.f32 %v142_v50 }
 0x139   :  { %v155_v58 = vor.u32 1.1754944e-38, %v154_v54  ;;  %vm153_vm10 = vcmp.eq.f32.partialorder %v152_v56, 8.507059e+37 }
 0x13d   :  { %v261_v51 = vpop.eup %260 }
 0x13e   :  { %v144_v52 = vmul.f32 %v261_v51, %v142_v50  ;;  %vm149_vm7 = vweird.f32 %v261_v51 }
 0x13f   :  { %vm150_vm9 = vmor %vm148_vm8, %vm149_vm7 }
 0x140   :  { %v145_v53 = vsub.f32 1.0, %v144_v52 }
 0x142   :  { %v146_v55 = vmul.f32 %v261_v51, %v145_v53 }
 0x144   :  { %v147_v57 = vadd.f32 %v261_v51, %v146_v55 }
 0x146   :  { %v151_v59 = vsel %vm150_vm9, %v261_v51, %v147_v57 }
 0x147   :  { %v156_v60 = vsel %vm153_vm10, %v155_v58, %v151_v59 }
 0x148   :  { %v158_v61 = vmul.f32 %v156_v60, %v137_v38 }
 0x14a   :  { %242 = vmatmul.msk.f32.vlgmr.msra.gmra.mxu2 %vm115_vm5, %v158_v61 }
 0x1cd   :  { %v191_v63 = vpop.f32.mrf.mxu2 }
 0x1ce   :  { %v192_v0 = vadd.f32 %v253_v62, %v191_v63 }
 0x1d0   :  { %262 = vtanh.f32 %v192_v0  ;;  %218 = vrot.lane.b32.xlu0 %v192_v0, %s319_s16 }
 0x1d6   :  { %v263_v3 = vpop.eup %262 }
 0x1d7   :  { %v201_v4 = vadd.f32 %v263_v3, %v200_v2 }
 0x1d9   :  { %214 = vst.msk [vmem:[#allocation5] sm:$0xff] %vm210_vm6, %v201_v4 }
 0x1da   :  { %216 = vst.msk [vmem:[#allocation5] sm:$0xff] %vm215_vm11, %v213_v5 }
 0x242   :  { %v219_v6 = vpop.permute.xlu0 %218 }
 0x243   :  { %222 = vst.msk [vmem:[#allocation5] sm:$0xff] %vm221_vm12, %v219_v6 }
 0x244   :  { %233 = dma.vmem_to_hbm [thread:$0]  %s229_s2, 128, %s231_s18, [#allocation4]  }
 0x245   :  { %314 = dma.done.wait [#allocation4], 128  }
 0x246   :  { %315 = vsyncadd [#allocation4], 4294967168 }
 0x247   :  { %238 = vsyncpa [#allocation3], 1 }
 0x248   :  { %239 = vsyncpa [#allocation4], 1 }

</bundles_post_ra>
